<compile_context>
chip_gen: v7x
topology: tpu7x:2x2x1
jax: 0.10.0
libtpu: 0.0.40
codegen_flags: <defaults>
</compile_context>

<pallas_src>
import functools

import jax
import jax.numpy as jnp
from jax import lax
from jax.experimental import pallas as pl
from jax.experimental.pallas import tpu as pltpu

K = 5  # Conv1d kernel_size from the module


def _textcnn_kernel(seed_ref, tok_ref, emb_ref, wc_ref, bc_ref, wf_ref, bf_ref,
                    out_ref, *, training):
    # seed_ref: (1,)  int32  SMEM
    # tok_ref : (B*L, 1) int32 (row r = b*L + l  ->  tokens[l, b])
    # emb_ref : (V, E) bf16
    # wc_ref  : (K, E, H) bf16   (wc[k, e, h] == torch w_conv[h, e, k])
    # bc_ref  : (1, H) f32
    # wf_ref  : (H, O_pad) bf16  (columns >= O are zero)
    # bf_ref  : (1, O_pad) f32
    # out_ref : (B, O_pad) f32   (lane-dense store; true O sliced outside)
    BL = tok_ref.shape[0]
    V, E = emb_ref.shape
    Kk, _, H = wc_ref.shape
    B, O_pad = out_ref.shape
    L = BL // B
    L_out = L - Kk + 1

    # --- embedding lookup fused as a one-hot matmul on the MXU ---
    # TODO(synk): at real vocab sizes replace with a scalar-prefetch gather
    # (PrefetchScalarGridSpec + pl.Element row index_map / HBM-resident table + DMA);
    # one-hot is O(BL*V) and only acceptable at toy V.
    tok = tok_ref[...]                                                     # (BL, 1)
    onehot = (lax.broadcasted_iota(jnp.int32, (BL, V), 1) == tok)
    onehot = onehot.astype(jnp.bfloat16)                                   # exact 0/1
    x = jnp.dot(onehot, emb_ref[...],
                preferred_element_type=jnp.float32)                        # (BL, E) f32

    # --- Conv1d(k=K): K accumulated matmuls on sublane-rolled copies of x ---
    # roll(shift=BL-k)[r] == x[(r + k) mod BL]; wrapped rows only reach positions
    # l >= L_out, which are masked out at pooling.
    conv = jnp.dot(x.astype(jnp.bfloat16), wc_ref[0],
                   preferred_element_type=jnp.float32)                     # (BL, H) f32
    for k in range(1, Kk):
        xk = pltpu.roll(x, shift=BL - k, axis=0).astype(jnp.bfloat16)
        conv = conv + jnp.dot(xk, wc_ref[k], preferred_element_type=jnp.float32)
    conv = jnp.maximum(conv + bc_ref[...], 0.0)                            # ReLU

    # --- global average pool over the L_out valid conv positions of each sequence ---
    pos = lax.broadcasted_iota(jnp.int32, (1, L, 1), 1)
    pool_w = jnp.where(pos < L_out, jnp.float32(1.0 / L_out), jnp.float32(0.0))
    pooled = (conv.reshape(B, L, H) * pool_w).sum(axis=1)                  # (B, H) f32

    if training:
        # F.dropout(x, 0.5) training semantics. Mask from an integer hash on raw
        # bits (exact p = 0.5); skipped entirely when training=False.
        seed_u = seed_ref[0].astype(jnp.uint32)
        idx = (lax.broadcasted_iota(jnp.int32, (B, H), 0) * H
               + lax.broadcasted_iota(jnp.int32, (B, H), 1)).astype(jnp.uint32)
        z = idx + seed_u * jnp.uint32(0x9E3779B9)
        z = z ^ (z >> 16)
        z = z * jnp.uint32(0x85EBCA6B)
        z = z ^ (z >> 13)
        z = z * jnp.uint32(0xC2B2AE35)
        z = z ^ (z >> 16)
        keep = z >= jnp.uint32(0x80000000)
        pooled = jnp.where(keep, pooled * 2.0, 0.0)

    # --- classifier (lane-dense O_pad-wide output) ---
    out = jnp.dot(pooled.astype(jnp.bfloat16), wf_ref[...],
                  preferred_element_type=jnp.float32) + bf_ref[...]        # (B, O_pad)
    out_ref[...] = out.astype(out_ref.dtype)


def prepare_params(emb_table, w_conv, b_conv, w_fc, b_fc):
    """One-time weight reshuffle (hoisted out of the per-call forward path)."""
    H, E, Kk = w_conv.shape
    assert Kk == K
    O = w_fc.shape[0]
    O_pad = ((O + 127) // 128) * 128                                  # lane-dense output
    emb = emb_table.astype(jnp.bfloat16)                              # (V, E)
    wc = jnp.transpose(w_conv, (2, 1, 0)).astype(jnp.bfloat16)        # (K, E, H)
    bc = b_conv.reshape(1, H).astype(jnp.float32)
    wf = jnp.zeros((H, O_pad), jnp.bfloat16).at[:, :O].set(
        jnp.transpose(w_fc).astype(jnp.bfloat16))                     # (H, O_pad)
    bf = jnp.zeros((1, O_pad), jnp.float32).at[0, :O].set(b_fc.astype(jnp.float32))
    return emb, wc, bc, wf, bf


def textcnn_forward(params, tokens, seed, *, out_size, training=True):
    """tokens: (L, B) int32, seq-first like the PyTorch module. Returns (B, out_size) f32."""
    emb, wc, bc, wf, bf = params
    L, B = tokens.shape
    V, E = emb.shape
    H, O_pad = wf.shape
    BL = B * L

    # Only the tiny int32 token matrix is touched outside the kernel.
    tok_col = jnp.transpose(tokens).reshape(BL, 1).astype(jnp.int32)
    seed_arr = jnp.full((1,), seed, dtype=jnp.int32)

    cost = pl.CostEstimate(
        flops=2 * BL * V * E + 2 * K * BL * E * H + 2 * B * H * O_pad,
        transcendentals=0,
        bytes_accessed=(tok_col.size * 4 + emb.size * 2 + wc.size * 2
                        + bc.size * 4 + wf.size * 2 + bf.size * 4 + B * O_pad * 4),
    )

    # Single grid point: everything fits VMEM trivially at these sizes.
    # TODO(synk): for v7x at larger batch, add a batch grid axis with
    # dimension_semantics=("parallel",), constant index_maps on the weights so they are
    # DMA'd once, and re-budget VMEM against v7x's 64 MiB (large embedding tables stay
    # in HBM via pl.ANY + DMA gather instead of VMEM-resident).
    out_full = pl.pallas_call(
        functools.partial(_textcnn_kernel, training=training),
        out_shape=jax.ShapeDtypeStruct((B, O_pad), jnp.float32),
        in_specs=[
            pl.BlockSpec(memory_space=pltpu.MemorySpace.SMEM),   # seed
            pl.BlockSpec(memory_space=pltpu.MemorySpace.VMEM),   # tokens (B*L, 1)
            pl.BlockSpec(memory_space=pltpu.MemorySpace.VMEM),   # embedding table (V, E)
            pl.BlockSpec(memory_space=pltpu.MemorySpace.VMEM),   # conv weight (K, E, H)
            pl.BlockSpec(memory_space=pltpu.MemorySpace.VMEM),   # conv bias (1, H)
            pl.BlockSpec(memory_space=pltpu.MemorySpace.VMEM),   # fc weight (H, O_pad)
            pl.BlockSpec(memory_space=pltpu.MemorySpace.VMEM),   # fc bias (1, O_pad)
        ],
        out_specs=pl.BlockSpec(memory_space=pltpu.MemorySpace.VMEM),
        cost_estimate=cost,
    )(seed_arr, tok_col, emb, wc, bc, wf, bf)

    return out_full[:, :out_size]


if __name__ == "__main__":
    vocab_size = 50
    embedding_dim = 32
    hidden_size = 128
    out_size = 8
    seq_len = 16     # must be > 5
    batch = 8

    key = jax.random.PRNGKey(0)
    k_tok, k_emb, k_wc, k_bc, k_wf, k_bf = jax.random.split(key, 6)

    tokens = jax.random.randint(k_tok, (seq_len, batch), 0, vocab_size, dtype=jnp.int32)
    emb_table = jax.random.normal(k_emb, (vocab_size, embedding_dim), jnp.float32) * 0.1
    w_conv = jax.random.normal(k_wc, (hidden_size, embedding_dim, K), jnp.float32) * 0.1
    b_conv = jax.random.normal(k_bc, (hidden_size,), jnp.float32) * 0.1
    w_fc = jax.random.normal(k_wf, (out_size, hidden_size), jnp.float32) * 0.1
    b_fc = jax.random.normal(k_bf, (out_size,), jnp.float32) * 0.1

    params = prepare_params(emb_table, w_conv, b_conv, w_fc, b_fc)   # once, not per call
    forward = jax.jit(textcnn_forward, static_argnames=("out_size", "training"))

    # Numerics check of the deterministic path (dropout off) against a pure-JAX reference.
    out_eval = jax.block_until_ready(
        forward(params, tokens, 0, out_size=out_size, training=False))
    x_emb = emb_table[tokens]                               # (L, B, E)
    x_bte = jnp.transpose(x_emb, (1, 0, 2))                 # (B, L, E)
    L_out = seq_len - K + 1
    win = jnp.stack([x_bte[:, k:k + L_out, :] for k in range(K)], axis=2)  # (B,L_out,K,E)
    conv_ref = jnp.maximum(jnp.einsum('btke,hek->bth', win, w_conv) + b_conv, 0.0)
    ref = conv_ref.mean(axis=1) @ w_fc.T + b_fc             # (B, O)
    assert out_eval.shape == (batch, out_size), out_eval.shape
    assert bool(jnp.allclose(out_eval, ref, rtol=1e-1, atol=3e-2)), (
        float(jnp.max(jnp.abs(out_eval - ref))))

    # Spec semantics: the module calls F.dropout(x, 0.5) with default training=True.
    out = jax.block_until_ready(forward(params, tokens, 1234, out_size=out_size))
    assert out.shape == (batch, out_size), out.shape
    assert bool(jnp.all(jnp.isfinite(out)))
    # TODO(synk): dropout RNG stream differs from torch's — same p=0.5 training
    # semantics, not bit-identical masks.
    print("KERNEL_OK")
</pallas_src>

<mosaic_0001>
module attributes {stable_mosaic.version = 11 : i64} {
  func.func @_textcnn_kernel(%arg0: memref<1xi32, #tpu.memory_space<smem>>, %arg1: memref<128x1xi32, #tpu.memory_space<vmem>>, %arg2: memref<50x32xbf16, #tpu.memory_space<vmem>>, %arg3: memref<5x32x128xbf16, #tpu.memory_space<vmem>>, %arg4: memref<1x128xf32, #tpu.memory_space<vmem>>, %arg5: memref<128x128xbf16, #tpu.memory_space<vmem>>, %arg6: memref<1x128xf32, #tpu.memory_space<vmem>>, %arg7: memref<8x128xf32, #tpu.memory_space<vmem>>) attributes {dimension_semantics = [], scalar_prefetch = 0 : i64, scratch_operands = 0 : i64, tpu.core_type = #tpu.core_type<tc>} {
    %c0 = arith.constant 0 : index
    %c0_0 = arith.constant 0 : index
    %0 = vector.load %arg1[%c0, %c0_0] : memref<128x1xi32, #tpu.memory_space<vmem>>, vector<128x1xi32>
    %1 = tpu.iota {dimensions = array<i32: 1>} : vector<128x50xi32>
    %2 = vector.broadcast %0 : vector<128x1xi32> to vector<128x50xi32>
    %3 = arith.cmpi eq, %1, %2 : vector<128x50xi32>
    %4 = arith.extui %3 : vector<128x50xi1> to vector<128x50xi32>
    %5 = arith.sitofp %4 : vector<128x50xi32> to vector<128x50xf32>
    %6 = arith.truncf %5 : vector<128x50xf32> to vector<128x50xbf16>
    %c0_1 = arith.constant 0 : index
    %c0_2 = arith.constant 0 : index
    %7 = vector.load %arg2[%c0_1, %c0_2] : memref<50x32xbf16, #tpu.memory_space<vmem>>, vector<50x32xbf16>
    %cst = arith.constant dense<0.000000e+00> : vector<128x32xf32>
    %8 = tpu.matmul %6, %7, %cst {dimension_numbers = #tpu.dot_dimension_numbers<[1], [0], [0], [1], [0, 0, 1, 1], [], []>} : vector<128x50xbf16>, vector<50x32xbf16>, vector<128x32xf32> -> vector<128x32xf32>
    %9 = arith.truncf %8 : vector<128x32xf32> to vector<128x32xbf16>
    %c0_3 = arith.constant 0 : index
    %c0_4 = arith.constant 0 : index
    %c0_5 = arith.constant 0 : index
    %10 = vector.load %arg3[%c0_3, %c0_4, %c0_5] : memref<5x32x128xbf16, #tpu.memory_space<vmem>>, vector<1x32x128xbf16>
    %11 = vector.shape_cast %10 : vector<1x32x128xbf16> to vector<32x128xbf16>
    %cst_6 = arith.constant dense<0.000000e+00> : vector<128x128xf32>
    %12 = tpu.matmul %9, %11, %cst_6 {dimension_numbers = #tpu.dot_dimension_numbers<[1], [0], [0], [1], [0, 0, 1, 1], [], []>} : vector<128x32xbf16>, vector<32x128xbf16>, vector<128x128xf32> -> vector<128x128xf32>
    %c127_i32 = arith.constant 127 : i32
    %13 = tpu.dynamic_rotate %8 by %c127_i32 dim 0 : vector<128x32xf32>, i32 -> vector<128x32xf32>
    %14 = arith.truncf %13 : vector<128x32xf32> to vector<128x32xbf16>
    %c1 = arith.constant 1 : index
    %c0_7 = arith.constant 0 : index
    %c0_8 = arith.constant 0 : index
    %15 = vector.load %arg3[%c1, %c0_7, %c0_8] : memref<5x32x128xbf16, #tpu.memory_space<vmem>>, vector<1x32x128xbf16>
    %16 = vector.shape_cast %15 : vector<1x32x128xbf16> to vector<32x128xbf16>
    %cst_9 = arith.constant dense<0.000000e+00> : vector<128x128xf32>
    %17 = tpu.matmul %14, %16, %cst_9 {dimension_numbers = #tpu.dot_dimension_numbers<[1], [0], [0], [1], [0, 0, 1, 1], [], []>} : vector<128x32xbf16>, vector<32x128xbf16>, vector<128x128xf32> -> vector<128x128xf32>
    %18 = arith.addf %12, %17 : vector<128x128xf32>
    %c126_i32 = arith.constant 126 : i32
    %19 = tpu.dynamic_rotate %8 by %c126_i32 dim 0 : vector<128x32xf32>, i32 -> vector<128x32xf32>
    %20 = arith.truncf %19 : vector<128x32xf32> to vector<128x32xbf16>
    %c2 = arith.constant 2 : index
    %c0_10 = arith.constant 0 : index
    %c0_11 = arith.constant 0 : index
    %21 = vector.load %arg3[%c2, %c0_10, %c0_11] : memref<5x32x128xbf16, #tpu.memory_space<vmem>>, vector<1x32x128xbf16>
    %22 = vector.shape_cast %21 : vector<1x32x128xbf16> to vector<32x128xbf16>
    %cst_12 = arith.constant dense<0.000000e+00> : vector<128x128xf32>
    %23 = tpu.matmul %20, %22, %cst_12 {dimension_numbers = #tpu.dot_dimension_numbers<[1], [0], [0], [1], [0, 0, 1, 1], [], []>} : vector<128x32xbf16>, vector<32x128xbf16>, vector<128x128xf32> -> vector<128x128xf32>
    %24 = arith.addf %18, %23 : vector<128x128xf32>
    %c125_i32 = arith.constant 125 : i32
    %25 = tpu.dynamic_rotate %8 by %c125_i32 dim 0 : vector<128x32xf32>, i32 -> vector<128x32xf32>
    %26 = arith.truncf %25 : vector<128x32xf32> to vector<128x32xbf16>
    %c3 = arith.constant 3 : index
    %c0_13 = arith.constant 0 : index
    %c0_14 = arith.constant 0 : index
    %27 = vector.load %arg3[%c3, %c0_13, %c0_14] : memref<5x32x128xbf16, #tpu.memory_space<vmem>>, vector<1x32x128xbf16>
    %28 = vector.shape_cast %27 : vector<1x32x128xbf16> to vector<32x128xbf16>
    %cst_15 = arith.constant dense<0.000000e+00> : vector<128x128xf32>
    %29 = tpu.matmul %26, %28, %cst_15 {dimension_numbers = #tpu.dot_dimension_numbers<[1], [0], [0], [1], [0, 0, 1, 1], [], []>} : vector<128x32xbf16>, vector<32x128xbf16>, vector<128x128xf32> -> vector<128x128xf32>
    %30 = arith.addf %24, %29 : vector<128x128xf32>
    %c124_i32 = arith.constant 124 : i32
    %31 = tpu.dynamic_rotate %8 by %c124_i32 dim 0 : vector<128x32xf32>, i32 -> vector<128x32xf32>
    %32 = arith.truncf %31 : vector<128x32xf32> to vector<128x32xbf16>
    %c4 = arith.constant 4 : index
    %c0_16 = arith.constant 0 : index
    %c0_17 = arith.constant 0 : index
    %33 = vector.load %arg3[%c4, %c0_16, %c0_17] : memref<5x32x128xbf16, #tpu.memory_space<vmem>>, vector<1x32x128xbf16>
    %34 = vector.shape_cast %33 : vector<1x32x128xbf16> to vector<32x128xbf16>
    %cst_18 = arith.constant dense<0.000000e+00> : vector<128x128xf32>
    %35 = tpu.matmul %32, %34, %cst_18 {dimension_numbers = #tpu.dot_dimension_numbers<[1], [0], [0], [1], [0, 0, 1, 1], [], []>} : vector<128x32xbf16>, vector<32x128xbf16>, vector<128x128xf32> -> vector<128x128xf32>
    %36 = arith.addf %30, %35 : vector<128x128xf32>
    %c0_19 = arith.constant 0 : index
    %c0_20 = arith.constant 0 : index
    %37 = vector.load %arg4[%c0_19, %c0_20] : memref<1x128xf32, #tpu.memory_space<vmem>>, vector<1x128xf32>
    %38 = vector.broadcast %37 : vector<1x128xf32> to vector<128x128xf32>
    %39 = arith.addf %36, %38 : vector<128x128xf32>
    %cst_21 = arith.constant 0.000000e+00 : f32
    %40 = vector.broadcast %cst_21 : f32 to vector<128x128xf32>
    %41 = arith.maximumf %39, %40 : vector<128x128xf32>
    %42 = tpu.iota {dimensions = array<i32: 1>} : vector<1x16x1xi32>
    %c12_i32 = arith.constant 12 : i32
    %43 = vector.broadcast %c12_i32 : i32 to vector<1x16x1xi32>
    %44 = arith.cmpi slt, %42, %43 : vector<1x16x1xi32>
    %cst_22 = arith.constant 0.0833333358 : f32
    %cst_23 = arith.constant 0.000000e+00 : f32
    %45 = vector.broadcast %cst_22 : f32 to vector<1x16x1xf32>
    %46 = vector.broadcast %cst_23 : f32 to vector<1x16x1xf32>
    %47 = arith.select %44, %45, %46 : vector<1x16x1xi1>, vector<1x16x1xf32>
    %48 = vector.shape_cast %41 : vector<128x128xf32> to vector<8x16x128xf32>
    %49 = vector.broadcast %47 : vector<1x16x1xf32> to vector<8x16x128xf32>
    %50 = arith.mulf %48, %49 : vector<8x16x128xf32>
    %cst_24 = arith.constant dense<0.000000e+00> : vector<8x128xf32>
    %51 = vector.multi_reduction <add>, %50, %cst_24 [1] : vector<8x16x128xf32> to vector<8x128xf32>
    %52 = arith.truncf %51 : vector<8x128xf32> to vector<8x128xbf16>
    %c0_25 = arith.constant 0 : index
    %c0_26 = arith.constant 0 : index
    %53 = vector.load %arg5[%c0_25, %c0_26] : memref<128x128xbf16, #tpu.memory_space<vmem>>, vector<128x128xbf16>
    %cst_27 = arith.constant dense<0.000000e+00> : vector<8x128xf32>
    %54 = tpu.matmul %52, %53, %cst_27 {dimension_numbers = #tpu.dot_dimension_numbers<[1], [0], [0], [1], [0, 0, 1, 1], [], []>} : vector<8x128xbf16>, vector<128x128xbf16>, vector<8x128xf32> -> vector<8x128xf32>
    %c0_28 = arith.constant 0 : index
    %c0_29 = arith.constant 0 : index
    %55 = vector.load %arg6[%c0_28, %c0_29] : memref<1x128xf32, #tpu.memory_space<vmem>>, vector<1x128xf32>
    %56 = vector.broadcast %55 : vector<1x128xf32> to vector<8x128xf32>
    %57 = arith.addf %54, %56 : vector<8x128xf32>
    %c0_30 = arith.constant 0 : index
    %c0_31 = arith.constant 0 : index
    %58 = vector.load %arg7[%c0_30, %c0_31] : memref<8x128xf32, #tpu.memory_space<vmem>>, vector<8x128xf32>
    tpu.vector_store %arg7[%c0_30, %c0_31], %57 {strides = array<i32>} : memref<8x128xf32, #tpu.memory_space<vmem>>, vector<8x128xf32>,
    return
  }
}

</mosaic_0001>

<bundles_post_ra>
// kernel: textcnn_forward.1
= control target key start
LH: loop header
LB: loop body
LE: loop exit
PB: predicated region body
PF: predicated region fallthrough
CT: control target
= control target key end

     0   :  { %v1939_v2 = vmov 0   ;;  %vm204_vm0 = vcmask 1040384   ;;  %s2763_s0 = inlined_call_operand.<no memory space> [shape: s32[1], index: 0, kind: input, shape index: {}]   ;;  %s2764_s1 = inlined_call_operand.vmem [shape: s32[128,1], index: 1, kind: input, shape index: {}]   ;;  %s2765_s2 = inlined_call_operand.vmem [shape: bf16[50,32], index: 2, kind: input, shape index: {}]   ;;  %s2766_s3 = inlined_call_operand.vmem [shape: bf16[5,32,128], index: 3, kind: input, shape index: {}]   ;;  %s2767_s4 = inlined_call_operand.vmem [shape: f32[1,128], index: 4, kind: input, shape index: {}]   ;;  %s2768_s5 = inlined_call_operand.vmem [shape: bf16[128,128], index: 5, kind: input, shape index: {}]   ;;  %s2769_s6 = inlined_call_operand.vmem [shape: f32[1,128], index: 6, kind: input, shape index: {}]   ;;  %s2770_s7 = inlined_call_operand.hbm [shape: f32[8,128], index: 7, kind: output, shape index: {}]  }
   0x1   :  { %v31_v0 = vld [vmem:[%s2764_s1 + $0x10] sm:$0xff]  ;;  %v29_v1 = vld [vmem:[%s2764_s1] sm:$0xff]  ;;  %1892 = vset.pattern.permute.xlu1 %v1939_v2  ;;  %1891 = vset.pattern.permute.xlu0 %v1939_v2  ;;  %v32_v3 = vld [vmem:[%s2764_s1 + $0x18] sm:$0xff] }
   0x2   :  { %54 = vperm.xlu1 %1892, %v31_v0   ;;  %48 = vperm.xlu0 %1891, %v29_v1   ;;  %v30_v4 = vld [vmem:[%s2764_s1 + $0x8] sm:$0xff]  ;;  %v33_v6 = vld [vmem:[%s2764_s1 + $0x20] sm:$0xff]  ;;  %v1896_v9 = vld [vmem:[%s2765_s2 + $0x18] ss:$0 sps:$4 sm:$0x11]  }
   0x3   :  { %v34_v5 = vld [vmem:[%s2764_s1 + $0x28] sm:$0xff]  ;;  %v1893_v7 = vld [vmem:[%s2765_s2] sm:$0xff]   ;;  %v36_v10 = vld [vmem:[%s2764_s1 + $0x38] sm:$0xff]  ;;  %v206_v13 = vsel %vm204_vm0, %v1896_v9, 0 }
   0x4   :  { %v1894_v8 = vld [vmem:[%s2765_s2 + $0x8] sm:$0xff]   ;;  %1674 = vmatprep.subr.bf16.mxu0 %v1893_v7  ;;  %v35_v11 = vld [vmem:[%s2764_s1 + $0x30] sm:$0xff]  ;;  %v37_v15 = vld [vmem:[%s2764_s1 + $0x40] sm:$0xff] }
   0x5   :  { %1675 = vmatpush3.bf16.msra.mxu0 %v1893_v7  ;;  %v1895_v12 = vld [vmem:[%s2765_s2 + $0x10] sm:$0xff]   ;;  %v38_v14 = vld [vmem:[%s2764_s1 + $0x48] sm:$0xff]  ;;  %v40_v16 = vld [vmem:[%s2764_s1 + $0x58] sm:$0xff] }
   0x6   :  { %57 = vperm.xlu1 %1892, %v32_v3   ;;  %51 = vperm.xlu0 %1891, %v30_v4   ;;  %v39_v17 = vld [vmem:[%s2764_s1 + $0x50] sm:$0xff] }
   0x7   :  { %1676 = vmatprep.subr.bf16.mxu0 %v1894_v8 }
   0x9   :  { %1677 = vmatpush3.bf16.msra.mxu0 %v1894_v8 }
   0xa   :  { %63 = vperm.xlu1 %1892, %v34_v5   ;;  %60 = vperm.xlu0 %1891, %v33_v6  }
   0xb   :  { %1678 = vmatprep.subr.bf16.mxu0 %v1895_v12 }
   0xd   :  { %1679 = vmatpush3.bf16.msra.mxu0 %v1895_v12 }
   0xe   :  { %69 = vperm.xlu1 %1892, %v36_v10   ;;  %66 = vperm.xlu0 %1891, %v35_v11  }
   0xf   :  { %1886 = vmatprep.subr.msk.bf16.mxu0 %vm204_vm0, %v1896_v9 }
  0x11   :  { %1681 = vmatpush3.bf16.msra.mxu0 %v206_v13 }
  0x12   :  { %75 = vperm.xlu1 %1892, %v38_v14   ;;  %72 = vperm.xlu0 %1891, %v37_v15  }
  0x13   :  { %13 = vsyncpa [#allocation4], 0  ;;  %v42_v18 = vld [vmem:[%s2764_s1 + $0x68] sm:$0xff]  ;;  %v41_v19 = vld [vmem:[%s2764_s1 + $0x60] sm:$0xff]  ;;  %v45_v22 = vlaneseq  ;;  %vm179_vm5 = vcmask 408576   ;;  %v2772_v28 = vmov 0.0  }
  0x14   :  { %v44_v20 = vld [vmem:[%s2764_s1 + $0x78] sm:$0xff]  ;;  %v43_v21 = vld [vmem:[%s2764_s1 + $0x70] sm:$0xff]  ;;  %v2097_v3 = vld [vmem:[%s2766_s3] sm:$0xff]   ;;  %s1942_s24 = smov [#allocation3]  }
  0x15   :  { %v2046_v23 = vand.u32 127, %v45_v22  ;;  %v1897_v1 = vld [vmem:[%s2766_s3 + $0x10] sm:$0xff]   ;;  %v1898_v2 = vld [vmem:[%s2766_s3 + $0x18] sm:$0xff]   ;;  %v2103_v4 = vld [vmem:[%s2766_s3 + $0x20] sm:$0xff]   ;;  %v2107_v5 = vshrl.u32 %v45_v22, 7  ;;  %s1491_s25 = sshll.u32 %s1942_s24, 4  ;;  %s1492_s25 = int_to_ptr.vmem [resolvable:$true] %s1491_s25 }
  0x16   :  { %81 = vperm.xlu1 %1892, %v40_v16   ;;  %78 = vperm.xlu0 %1891, %v39_v17   ;;  %s1915_s26 = scalar_lea.vmem %s1492_s25, 128  ;;  %p1920_p1 = scmp.lt.s32.totalorder %s1492_s25, %s1492_s25 }
  0x17   :  { %1698 = vmatprep.subr.bf16.mxu0 %v1897_v1  ;;  %1818 = vmatprep.subr.bf16.mxu1 %v1897_v1  ;;  %p1916_p0 = scmp.ne.s32.totalorder %s1492_s25, %s1915_s26  ;;  %p1921_p2 = scmp.lt.s32.totalorder %s1915_s26, %s1915_s26 }
  0x18   :  { %1820 = vmatpush3.bf16.msra.mxu1 %v1897_v1 }
  0x19   :  { %1819 = vmatprep.subr.bf16.mxu1 %v1898_v2  ;;  %p1922_p3 = por %p1921_p2, %p1920_p1 }
  0x1a   :  { %87 = vperm.xlu1 %1892, %v42_v18   ;;  %84 = vperm.xlu0 %1891, %v41_v19  }
  0x1b   :  { %p1923_p4 = pnand %p1922_p3, %p1916_p0 }
  0x1c   :  { %1821 = vmatpush3.bf16.msra.mxu1 %v1898_v2 }
  0x1d   :  { %1738 = vmatprep.subr.bf16.mxu1 %v2103_v4 }
  0x1e   :  { %93 = vperm.xlu1 %1892, %v44_v20   ;;  %90 = vperm.xlu0 %1891, %v43_v21  }
  0x81   :  { %v55_v24 = vpop.permute.xlu1 %54  ;;  %v49_v25 = vpop.permute.xlu0 %48 }
  0x82   :  { %vm97_vm1 = vcmp.eq.s32.totalorder %v2046_v23, %v55_v24  ;;  %vm95_vm2 = vcmp.eq.s32.totalorder %v2046_v23, %v49_v25 }
  0x83   :  { %v1501_v29 = vsel %vm97_vm1, 1.0, %v2772_v28  ;;  %v1499_v30 = vsel %vm95_vm2, 1.0, %v2772_v28  ;;  %vm335_vm2 = vcmp.lt.s32.totalorder %v2107_v5, 7 }
  0x85   :  { %v58_v26 = vpop.permute.xlu1 %57  ;;  %v52_v27 = vpop.permute.xlu0 %51 }
  0x86   :  { %vm98_vm3 = vcmp.eq.s32.totalorder %v2046_v23, %v58_v26  ;;  %vm96_vm4 = vcmp.eq.s32.totalorder %v2046_v23, %v52_v27 }
  0x87   :  { %v1502_v31 = vsel %vm98_vm3, 1.0, %v2772_v28  ;;  %v1500_v32 = vsel %vm96_vm4, 1.0, %v2772_v28  ;;  %vm843_vm3 = vcmp.lt.s32.totalorder %v2107_v5, 5  ;;  %vm1038_vm4 = vcmp.lt.s32.totalorder %v2107_v5, 4 }
  0x88   :  { %v144_v33 = vpack.c.bf16 %v1502_v31, %v1501_v29  ;;  %v143_v34 = vpack.c.bf16 %v1500_v32, %v1499_v30 }
  0x89   :  { %v64_v35 = vpop.permute.xlu1 %63  ;;  %v61_v36 = vpop.permute.xlu0 %60 }
  0x8a   :  { %vm100_vm6 = vcmp.eq.s32.totalorder %v2046_v23, %v64_v35  ;;  %vm99_vm7 = vcmp.eq.s32.totalorder %v2046_v23, %v61_v36  ;;  %1682 = vmatprep.mubr.msk.bf16.mxu0 %vm179_vm5, %v143_v34 }
  0x8b   :  { %v1504_v37 = vsel %vm100_vm6, 1.0, %v2772_v28  ;;  %v1503_v38 = vsel %vm99_vm7, 1.0, %v2772_v28  ;;  %1683 = vmatmul.mubr.msk.bf16.vlgmr.msra.gmra.mrb[0].mxu0 %vm179_vm5, %v144_v33  ;;  %vm648_vm6 = vcmp.lt.s32.totalorder %v2107_v5, 6  ;;  %vm1941_vm7 = vmmov 0  }
  0x8c   :  { %v145_v39 = vpack.c.bf16 %v1504_v37, %v1503_v38  ;;  %1699 = vmatpush3.bf16.msra.mxu0 %v1897_v1  ;;  %v1901_v1 = vld [vmem:[%s2766_s3 + $0x8] sm:$0xff]  }
  0x8d   :  { %v70_v40 = vpop.permute.xlu1 %69  ;;  %v67_v41 = vpop.permute.xlu0 %66  ;;  %1700 = vmatprep.subr.bf16.mxu0 %v1898_v2 }
  0x8e   :  { %vm102_vm8 = vcmp.eq.s32.totalorder %v2046_v23, %v70_v40  ;;  %vm101_vm9 = vcmp.eq.s32.totalorder %v2046_v23, %v67_v41  ;;  %1686 = vmatprep.mubr.msk.bf16.mxu0 %vm179_vm5, %v145_v39 }
  0x8f   :  { %v1506_v42 = vsel %vm102_vm8, 1.0, %v2772_v28  ;;  %v1505_v43 = vsel %vm101_vm9, 1.0, %v2772_v28  ;;  %vm1380_vm9 = vcmask 1041409  }
  0x90   :  { %v146_v44 = vpack.c.bf16 %v1506_v42, %v1505_v43  ;;  %1701 = vmatpush3.bf16.msra.mxu0 %v1898_v2 }
  0x91   :  { %v76_v45 = vpop.permute.xlu1 %75  ;;  %v73_v46 = vpop.permute.xlu0 %72  ;;  %1718 = vmatprep.subr.bf16.mxu0 %v2097_v3 }
  0x92   :  { %vm104_vm10 = vcmp.eq.s32.totalorder %v2046_v23, %v76_v45  ;;  %vm103_vm11 = vcmp.eq.s32.totalorder %v2046_v23, %v73_v46 }
  0x93   :  { %v1508_v47 = vsel %vm104_vm10, 1.0, %v2772_v28  ;;  %v1507_v48 = vsel %vm103_vm11, 1.0, %v2772_v28  ;;  %1687 = vmatmul.mubr.msk.bf16.gmra.mrb[4].mxu0 %vm179_vm5, %v146_v44  ;;  %vm1382_vm10 = vcmask 1042434   ;;  %vm1384_vm11 = vcmask 1043459  }
  0x94   :  { %v147_v49 = vpack.c.bf16 %v1508_v47, %v1507_v48 }
  0x95   :  { %v82_v50 = vpop.permute.xlu1 %81  ;;  %v79_v51 = vpop.permute.xlu0 %78 }
  0x96   :  { %vm106_vm12 = vcmp.eq.s32.totalorder %v2046_v23, %v82_v50  ;;  %vm105_vm13 = vcmp.eq.s32.totalorder %v2046_v23, %v79_v51  ;;  %1690 = vmatprep.mubr.msk.bf16.mxu0 %vm179_vm5, %v147_v49 }
  0x97   :  { %v1510_v52 = vsel %vm106_vm12, 1.0, %v2772_v28  ;;  %v1509_v53 = vsel %vm105_vm13, 1.0, %v2772_v28  ;;  %vm1386_vm12 = vcmask 1044484   ;;  %vm1388_vm13 = vcmask 1045509  }
  0x98   :  { %v148_v54 = vpack.c.bf16 %v1510_v52, %v1509_v53 }
  0x99   :  { %v88_v55 = vpop.permute.xlu1 %87  ;;  %v85_v56 = vpop.permute.xlu0 %84 }
  0x9a   :  { %vm108_vm14 = vcmp.eq.s32.totalorder %v2046_v23, %v88_v55  ;;  %vm107_vm15 = vcmp.eq.s32.totalorder %v2046_v23, %v85_v56 }
  0x9b   :  { %v1512_v57 = vsel %vm108_vm14, 1.0, %v2772_v28  ;;  %v1511_v58 = vsel %vm107_vm15, 1.0, %v2772_v28  ;;  %1691 = vmatmul.mubr.msk.bf16.gmra.mrb[8].mxu0 %vm179_vm5, %v148_v54  ;;  %vm1390_vm14 = vcmask 1046534   ;;  %vm1392_vm15 = vcmask 1047559  }
  0x9c   :  { %v149_v59 = vpack.c.bf16 %v1512_v57, %v1511_v58 }
  0x9d   :  { %v94_v60 = vpop.permute.xlu1 %93  ;;  %v91_v61 = vpop.permute.xlu0 %90 }
  0x9e   :  { %vm110_vm0 = vcmp.eq.s32.totalorder %v2046_v23, %v94_v60  ;;  %vm109_vm1 = vcmp.eq.s32.totalorder %v2046_v23, %v91_v61  ;;  %1694 = vmatprep.mubr.msk.bf16.mxu0 %vm179_vm5, %v149_v59 }
  0x9f   :  { %v1514_v62 = vsel %vm110_vm0, 1.0, %v2772_v28  ;;  %v1513_v63 = vsel %vm109_vm1, 1.0, %v2772_v28 }
  0xa0   :  { %v150_v0 = vpack.c.bf16 %v1514_v62, %v1513_v63 }
  0xa3   :  { %1695 = vmatmul.mubr.msk.bf16.gmra.mrb[12].mxu0 %vm179_vm5, %v150_v0  ;;  %vm377_vm5 = vcmask 261120  }
 0x15e   :  { %v2110_v6 = vpop.f32.mrb[0].mxu0 }
 0x15f   :  { %v319_v7 = vrot.slane %v2110_v6, 1  ;;  %v634_v8 = vrot.slane %v2110_v6, 2  ;;  %v829_v9 = vrot.slane %v2110_v6, 3  ;;  %v1024_v10 = vrot.slane %v2110_v6, 4  ;;  %v2119_v11 = vpop.f32.mrb[1].mxu0 }
 0x160   :  { %v317_v12 = vrot.slane %v2119_v11, 1  ;;  %v632_v13 = vrot.slane %v2119_v11, 2  ;;  %v2775_v14 = vrot.slane %v2119_v11, 3  ;;  %v2771_v15 = vrot.slane %v2119_v11, 4  ;;  %v2125_v16 = vpop.f32.mrb[2].mxu0 }
 0x161   :  { %v320_v18 = vrot.slane %v2125_v16, 1  ;;  %v635_v19 = vrot.slane %v2125_v16, 2  ;;  %v830_v20 = vrot.slane %v2125_v16, 3  ;;  %v2132_v21 = vpop.f32.mrb[3].mxu0  ;;  %v1025_v22 = vrot.slane %v2125_v16, 4 }
 0x162   :  { %v318_v23 = vrot.slane %v2132_v21, 1  ;;  %v633_v24 = vrot.slane %v2132_v21, 2  ;;  %v828_v25 = vrot.slane %v2132_v21, 3  ;;  %v1023_v29 = vrot.slane %v2132_v21, 4 }
 0x163   :  { %v348_v26 = vsel %vm335_vm2, %v319_v7, %v320_v18  ;;  %v2142_v27 = vsel %vm843_vm3, %v829_v9, %v830_v20  ;;  %v305_v30 = vpack.c.bf16 %v2132_v21, %v2119_v11  ;;  %v2149_v31 = vsel %vm1038_vm4, %v1024_v10, %v1025_v22 }
 0x164   :  { %v349_v32 = vsel %vm335_vm2, %v318_v23, %v319_v7  ;;  %v350_v33 = vsel %vm335_vm2, %v317_v12, %v318_v23  ;;  %v2159_v34 = vsel %vm648_vm6, %v633_v24, %v634_v8  ;;  %v2165_v36 = vsel %vm648_vm6, %v632_v13, %v633_v24 }
 0x165   :  { %v352_v35 = vpack.c.bf16 %v349_v32, %v350_v33  ;;  %v2169_v37 = vsel %vm648_vm6, %v634_v8, %v635_v19  ;;  %v2173_v38 = vsel %vm843_vm3, %v828_v25, %v829_v9  ;;  %v2183_v41 = vsel %vm843_vm3, %v2775_v14, %v828_v25 }
 0x166   :  { %v2175_v39 = vpop.f32.mrb[4].mxu0  ;;  %v2187_v42 = vsel %vm1038_vm4, %v1023_v29, %v1024_v10  ;;  %v2193_v43 = vsel %vm1038_vm4, %v2771_v15, %v1023_v29 }
 0x167   :  { %v323_v44 = vrot.slane %v2175_v39, 1  ;;  %v638_v45 = vrot.slane %v2175_v39, 2  ;;  %v2197_v46 = vpop.f32.mrb[5].mxu0  ;;  %1702 = vmatprep.mubr.msk.bf16.mxu0 %vm377_vm5, %v352_v35  ;;  %v833_v47 = vrot.slane %v2175_v39, 3 }
 0x168   :  { %v321_v48 = vrot.slane %v2197_v46, 1  ;;  %v2776_v49 = vrot.slane %v2197_v46, 3  ;;  %v2774_v50 = vrot.slane %v2197_v46, 4  ;;  %v2204_v51 = vpop.f32.mrb[6].mxu0  ;;  %v636_v53 = vrot.slane %v2197_v46, 2 }
 0x169   :  { %v324_v54 = vrot.slane %v2204_v51, 1  ;;  %v639_v55 = vrot.slane %v2204_v51, 2  ;;  %v2210_v56 = vpop.f32.mrb[7].mxu0 }
 0x16a   :  { %v347_v57 = vsel %vm335_vm2, %v320_v18, %v321_v48  ;;  %v2218_v58 = vsel %vm843_vm3, %v830_v20, %v2776_v49  ;;  %v2224_v59 = vsel %vm1038_vm4, %v1025_v22, %v2774_v50  ;;  %v322_v60 = vrot.slane %v2210_v56, 1 }
 0x16b   :  { %v353_v61 = vpack.c.bf16 %v347_v57, %v348_v26  ;;  %v637_v0 = vrot.slane %v2210_v56, 2  ;;  %v344_v18 = vsel %vm335_vm2, %v323_v44, %v324_v54  ;;  %v2248_v22 = vsel %vm648_vm6, %v635_v19, %v636_v53 }
 0x16c   :  { %v345_v8 = vsel %vm335_vm2, %v322_v60, %v323_v44  ;;  %v346_v9 = vsel %vm335_vm2, %v321_v48, %v322_v60  ;;  %v2311_v17 = vsel %vm648_vm6, %v638_v45, %v639_v55 }
 0x16d   :  { %1703 = vmatmul.mubr.msk.bf16.vlgmr.msra.gmra.mrb[16].mxu0 %vm377_vm5, %v353_v61  ;;  %v354_v10 = vpack.c.bf16 %v345_v8, %v346_v9  ;;  %v2259_v25 = vsel %vm648_vm6, %v637_v0, %v638_v45  ;;  %v2263_v26 = vsel %vm648_vm6, %v636_v53, %v637_v0 }
 0x16e   :  { %v2250_v23 = vpop.f32.mrb[8].mxu0  ;;  %1719 = vmatpush3.bf16.msra.mxu0 %v2097_v3 }
 0x16f   :  { %v327_v32 = vrot.slane %v2250_v23, 1  ;;  %v642_v33 = vrot.slane %v2250_v23, 2  ;;  %v2271_v35 = vpop.f32.mrb[9].mxu0  ;;  %1706 = vmatprep.mubr.msk.bf16.mxu0 %vm377_vm5, %v354_v10  ;;  %1720 = vmatprep.subr.bf16.mxu0 %v1901_v1 }
 0x170   :  { %v325_v53 = vrot.slane %v2271_v35, 1  ;;  %v640_v57 = vrot.slane %v2271_v35, 2  ;;  %v2278_v60 = vpop.f32.mrb[10].mxu0 }
 0x171   :  { %v328_v8 = vrot.slane %v2278_v60, 1  ;;  %v643_v9 = vrot.slane %v2278_v60, 2  ;;  %v2284_v10 = vpop.f32.mrb[11].mxu0 }
 0x172   :  { %v326_v19 = vrot.slane %v2284_v10, 1  ;;  %v641_v15 = vrot.slane %v2284_v10, 2  ;;  %1721 = vmatpush3.bf16.msra.mxu0 %v1901_v1  ;;  %v343_v24 = vsel %vm335_vm2, %v324_v54, %v325_v53  ;;  %v2305_v54 = vsel %vm648_vm6, %v639_v55, %v640_v57 }
 0x173   :  { %v340_v20 = vsel %vm335_vm2, %v327_v32, %v328_v8  ;;  %1798 = vmatprep.subr.bf16.mxu0 %v2772_v28  ;;  %v355_v62 = vpack.c.bf16 %v343_v24, %v344_v18  ;;  %v2332_v55 = vsel %vm648_vm6, %v642_v33, %v643_v9 }
 0x174   :  { %v341_v7 = vsel %vm335_vm2, %v326_v19, %v327_v32  ;;  %v342_v1 = vsel %vm335_vm2, %v325_v53, %v326_v19  ;;  %v2315_v18 = vsel %vm648_vm6, %v641_v15, %v642_v33  ;;  %v2319_v24 = vsel %vm648_vm6, %v640_v57, %v641_v15 }
 0x175   :  { %v356_v0 = vpack.c.bf16 %v341_v7, %v342_v1  ;;  %1707 = vmatmul.mubr.msk.bf16.gmra.mrb[20].mxu0 %vm377_vm5, %v355_v62  ;;  %v836_v15 = vrot.slane %v2284_v10, 3 }
 0x176   :  { %v2322_v19 = vpop.f32.mrb[12].mxu0 }
 0x177   :  { %v646_v62 = vrot.slane %v2322_v19, 2  ;;  %v841_v57 = vrot.slane %v2322_v19, 3  ;;  %v2338_v1 = vpop.f32.mrb[13].mxu0  ;;  %1710 = vmatprep.mubr.msk.bf16.mxu0 %vm377_vm5, %v356_v0  ;;  %v331_v7 = vrot.slane %v2322_v19, 1 }
 0x178   :  { %v329_v28 = vrot.slane %v2338_v1, 1  ;;  %v644_v45 = vrot.slane %v2338_v1, 2  ;;  %v839_v32 = vrot.slane %v2338_v1, 3  ;;  %v2344_v33 = vpop.f32.mrb[14].mxu0 }
 0x179   :  { %v332_v53 = vrot.slane %v2344_v33, 1  ;;  %v647_v50 = vrot.slane %v2344_v33, 2  ;;  %v842_v3 = vrot.slane %v2344_v33, 3  ;;  %v2351_v52 = vpop.f32.mrb[15].mxu0 }
 0x17a   :  { %v645_v14 = vrot.slane %v2351_v52, 2  ;;  %v840_v40 = vrot.slane %v2351_v52, 3  ;;  %v339_v63 = vsel %vm335_vm2, %v328_v8, %v329_v28  ;;  %v330_v48 = vrot.slane %v2351_v52, 1 }
 0x17b   :  { %v357_v44 = vpack.c.bf16 %v339_v63, %v340_v20  ;;  %v336_v2 = vsel %vm335_vm2, %v331_v7, %v332_v53  ;;  %v351_v61 = vsel %vm335_vm2, %v332_v53, %v317_v12  ;;  %v311_v0 = vpack.c.bf16 %v2351_v52, %v2338_v1 }
 0x17c   :  { %v359_v49 = vpack.c.bf16 %v351_v61, %v336_v2  ;;  %v2369_v29 = vsel %vm648_vm6, %v643_v9, %v644_v45  ;;  %v2373_v63 = vsel %vm648_vm6, %v645_v14, %v646_v62  ;;  %v337_v20 = vsel %vm335_vm2, %v330_v48, %v331_v7 }
 0x17d   :  { %v338_v8 = vsel %vm335_vm2, %v329_v28, %v330_v48  ;;  %v670_v12 = vpack.c.bf16 %v2369_v29, %v2332_v55  ;;  %v2383_v2 = vsel %vm648_vm6, %v644_v45, %v645_v14  ;;  %1711 = vmatmul.mubr.msk.bf16.gmra.mrb[24].mxu0 %vm377_vm5, %v357_v44  ;;  %v2392_v7 = vsel %vm648_vm6, %v646_v62, %v647_v50  ;;  %v1902_v28 = vld [vmem:[%s2766_s3 + $0x28] sm:$0xff]  }
 0x17e   :  { %v358_v61 = vpack.c.bf16 %v337_v20, %v338_v8  ;;  %1722 = vmatprep.mubr.msk.bf16.mxu0 %vm377_vm5, %v305_v30  ;;  %v2405_v14 = vsel %vm648_vm6, %v647_v50, %v632_v13  ;;  %v2777_v48 = vrot.slane %v2210_v56, 3  ;;  %v2779_v45 = vrot.slane %v2197_v46, 3  ;;  %v1906_v29 = vld [vmem:[%s2766_s3 + $0x48] sm:$0xff]  }
 0x17f   :  { %v2780_v20 = vrot.slane %v2271_v35, 3  ;;  %v2781_v8 = vrot.slane %v2204_v51, 3  ;;  %v845_v13 = vsel %vm843_vm3, %v840_v40, %v841_v57  ;;  %v1055_v53 = vpack.c.bf16 %v2187_v42, %v2193_v43 }
 0x180   :  { %v2415_v21 = vsel %vm843_vm3, %v2777_v48, %v833_v47  ;;  %v2778_v30 = vmov %v2777_v48  ;;  %1714 = vmatprep.mubr.msk.bf16.mxu1 %vm377_vm5, %v358_v61  ;;  %v2789_v9 = vrot.slane %v2175_v39, 4 }
 0x181   :  { %v2423_v62 = vsel %vm843_vm3, %v2779_v45, %v2778_v30  ;;  %v2436_v48 = vsel %vm843_vm3, %v2781_v8, %v2780_v20  ;;  %v2782_v44 = vmov %v2781_v8  ;;  %1715 = vmatmul.mubr.msk.bf16.vlgmr.msra.gmra.mrb[0].mxu1 %vm377_vm5, %v359_v49  ;;  %v2783_v45 = vrot.slane %v2250_v23, 3 }
 0x182   :  { %v2444_v61 = vsel %vm843_vm3, %v833_v47, %v2782_v44  ;;  %v2459_v8 = vsel %vm843_vm3, %v2780_v20, %v836_v15  ;;  %v2784_v47 = vrot.slane %v2278_v60, 3  ;;  %v1035_v44 = vrot.slane %v2351_v52, 4  ;;  %1739 = vmatpush3.bf16.msra.mxu1 %v2103_v4  ;;  %v1903_v4 = vld [vmem:[%s2766_s3 + $0x30] sm:$0xff]  }
 0x183   :  { %v2453_v50 = vsel %vm843_vm3, %v836_v15, %v2783_v45  ;;  %v2785_v45 = vpack.c.bf16 %v2159_v34, %v2165_v36  ;;  %v2787_v20 = vrot.slane %v2250_v23, 3  ;;  %1740 = vmatprep.subr.bf16.mxu1 %v1902_v28  ;;  %v846_v36 = vsel %vm843_vm3, %v839_v32, %v840_v40 }
 0x184   :  { %v2465_v49 = vsel %vm843_vm3, %v2784_v47, %v839_v32  ;;  %v864_v30 = vpack.c.bf16 %v2453_v50, %v2459_v8  ;;  %v2786_v15 = vmov %v2784_v47  ;;  %v844_v50 = vsel %vm843_vm3, %v841_v57, %v842_v3 }
 0x185   :  { %1742 = vmatprep.mubr.msk.bf16.mxu1 %vm377_vm5, %v2785_v45  ;;  %v848_v47 = vsel %vm843_vm3, %v2787_v20, %v2786_v15  ;;  %v2788_v8 = vrot.slane %v2119_v11, 3  ;;  %v866_v15 = vpack.c.bf16 %v845_v13, %v846_v36  ;;  %v2792_v57 = vrot.slane %v2197_v46, 4 }
 0x186   :  { %v865_v34 = vpack.c.bf16 %v2465_v49, %v848_v47  ;;  %v2790_v49 = vrot.slane %v2210_v56, 4  ;;  %v2794_v13 = vrot.slane %v2204_v51, 4  ;;  %v2796_v36 = vmov %v2789_v9  ;;  %1741 = vmatpush3.bf16.msra.mxu1 %v1902_v28 }
 0x187   :  { %v859_v45 = vsel %vm843_vm3, %v842_v3, %v2788_v8  ;;  %v2793_v3 = vrot.slane %v2271_v35, 4  ;;  %v2798_v8 = vrot.slane %v2284_v10, 4  ;;  %1758 = vmatprep.subr.bf16.mxu1 %v1903_v4  ;;  %v2803_v28 = vrot.slane %v2338_v1, 4 }
 0x188   :  { %v867_v20 = vpack.c.bf16 %v859_v45, %v844_v50  ;;  %v1048_v40 = vsel %vm1038_vm4, %v2790_v49, %v2789_v9  ;;  %v2791_v32 = vmov %v2790_v49  ;;  %v2795_v43 = vmov %v2794_v13 }
 0x189   :  { %v1049_v47 = vsel %vm1038_vm4, %v2792_v57, %v2791_v32  ;;  %v1046_v42 = vsel %vm1038_vm4, %v2794_v13, %v2793_v3  ;;  %v1047_v9 = vsel %vm1038_vm4, %v2796_v36, %v2795_v43  ;;  %v2797_v50 = vrot.slane %v2250_v23, 4 }
 0x18a   :  { %v1036_v49 = vrot.slane %v2322_v19, 4  ;;  %v2799_v32 = vpack.c.bf16 %v2125_v16, %v2110_v6  ;;  %v1057_v57 = vpack.c.bf16 %v1048_v40, %v1049_v47  ;;  %v1058_v3 = vpack.c.bf16 %v1046_v42, %v1047_v9  ;;  %v1904_v6 = vld [vmem:[%s2766_s3 + $0x38] sm:$0xff]  }
 0x18b   :  { %v1044_v45 = vsel %vm1038_vm4, %v2798_v8, %v2797_v50  ;;  %v2800_v13 = vmov %v2798_v8  ;;  %v2801_v43 = vrot.slane %v2271_v35, 4  ;;  %v2802_v50 = vpack.c.bf16 %v2210_v56, %v2197_v46 }
 0x18c   :  { %1723 = vmatmul.mubr.msk.bf16.vlgmr.msra.gmra.mrb[16].mxu0 %vm377_vm5, %v2799_v32  ;;  %v2804_v40 = vrot.slane %v2278_v60, 4  ;;  %v2806_v9 = vrot.slane %v2250_v23, 4  ;;  %v1040_v8 = vsel %vm1038_vm4, %v1035_v44, %v1036_v49  ;;  %v2820_v52 = vpack.c.bf16 %v2405_v14, %v2392_v7  ;;  %v1912_v7 = vld [vmem:[%s2768_s5 + $0x28] sm:$0xff]  }
 0x18d   :  { %v1045_v36 = vsel %vm1038_vm4, %v2801_v43, %v2800_v13  ;;  %1726 = vmatprep.mubr.msk.bf16.mxu0 %vm377_vm5, %v2802_v50  ;;  %v2808_v13 = vrot.slane %v2344_v33, 4 }
 0x18e   :  { %v1059_v16 = vpack.c.bf16 %v1044_v45, %v1045_v36  ;;  %v1042_v47 = vsel %vm1038_vm4, %v2804_v40, %v2803_v28  ;;  %v2805_v42 = vmov %v2804_v40  ;;  %v2807_v45 = vmov %v2803_v28 }
 0x18f   :  { %v1043_v46 = vsel %vm1038_vm4, %v2806_v9, %v2805_v42  ;;  %v1041_v32 = vsel %vm1038_vm4, %v2807_v45, %v1035_v44  ;;  %v1039_v43 = vsel %vm1038_vm4, %v1036_v49, %v2808_v13  ;;  %v2809_v36 = vpack.c.bf16 %v2248_v22, %v2169_v37  ;;  %v1905_v37 = vld [vmem:[%s2766_s3 + $0x40] sm:$0xff]  }
 0x190   :  { %v1060_v56 = vpack.c.bf16 %v1042_v47, %v1043_v46  ;;  %v1061_v50 = vpack.c.bf16 %v1040_v8, %v1041_v32  ;;  %v2810_v28 = vrot.slane %v2119_v11, 4  ;;  %v2811_v40 = vmov %v2808_v13 }
 0x191   :  { %1743 = vmatmul.mubr.msk.bf16.vlgmr.msra.gmra.mrb[4].mxu1 %vm377_vm5, %v2809_v36  ;;  %v2812_v44 = vpack.c.bf16 %v2259_v25, %v2263_v26  ;;  %v2813_v11 = vpack.c.bf16 %v2204_v51, %v2175_v39  ;;  %v2814_v22 = vpack.c.bf16 %v2284_v10, %v2271_v35  ;;  %v2815_v25 = vpack.c.bf16 %v2305_v54, %v2311_v17 }
 0x192   :  { %v1054_v47 = vsel %vm1038_vm4, %v2811_v40, %v2810_v28  ;;  %1759 = vmatpush3.bf16.msra.mxu1 %v1903_v4  ;;  %v2816_v26 = vpack.c.bf16 %v2315_v18, %v2319_v24  ;;  %v2817_v39 = vpack.c.bf16 %v2278_v60, %v2250_v23  ;;  %v2818_v17 = vpack.c.bf16 %v2373_v63, %v2383_v2  ;;  %v1909_v24 = vld [vmem:[%s2768_s5 + $0x10] sm:$0xff]   ;;  %v1911_v63 = vld [vmem:[%s2768_s5 + $0x20] sm:$0xff]  }
 0x193   :  { %1746 = vmatprep.mubr.msk.bf16.mxu1 %vm377_vm5, %v2812_v44  ;;  %v1062_v49 = vpack.c.bf16 %v1054_v47, %v1039_v43  ;;  %1760 = vmatprep.subr.bf16.mxu1 %v1904_v6  ;;  %v2819_v51 = vpack.c.bf16 %v2344_v33, %v2322_v19  ;;  %v2821_v23 = vpack.c.bf16 %v2173_v38, %v2183_v41  ;;  %v1907_v41 = vld [vmem:[%s2768_s5] sm:$0xff]   ;;  %v1910_v33 = vld [vmem:[%s2768_s5 + $0x18] sm:$0xff]   ;;  %v1256_v9 = vadd.s32 8, %v2107_v5 }
 0x194   :  { %1727 = vmatmul.mubr.msk.bf16.gmra.mrb[20].mxu0 %vm377_vm5, %v2813_v11  ;;  %v2822_v35 = vpack.c.bf16 %v2218_v58, %v2142_v27  ;;  %v2823_v60 = vpack.c.bf16 %v2415_v21, %v2423_v62  ;;  %v2824_v38 = vpack.c.bf16 %v2436_v48, %v2444_v61  ;;  %v2825_v27 = vpack.c.bf16 %v2224_v59, %v2149_v31  ;;  %v1908_v59 = vld [vmem:[%s2768_s5 + $0x8] sm:$0xff]   ;;  %v1913_v21 = vld [vmem:[%s2768_s5 + $0x30] sm:$0xff]  }
 0x195   :  { %1730 = vmatprep.mubr.msk.bf16.mxu0 %vm377_vm5, %v2814_v22  ;;  %1799 = vmatpush3.bf16.msra.mxu0 %v1907_v41  ;;  %v2826_v58 = vmov 0.0   ;;  %vm1258_vm8 = vcmp.lt.s32.totalorder %v1256_v9, 12 }
 0x196   :  { %1761 = vmatpush3.bf16.msra.mxu1 %v1904_v6  ;;  %1800 = vmatprep.subr.bf16.mxu0 %v2826_v58 }
 0x197   :  { %1778 = vmatprep.subr.bf16.mxu1 %v1905_v37 }
 0x199   :  { %1747 = vmatmul.mubr.msk.bf16.gmra.mrb[8].mxu1 %vm377_vm5, %v2815_v25  ;;  %1801 = vmatpush3.bf16.msra.mxu0 %v1908_v59 }
 0x19a   :  { %1750 = vmatprep.mubr.msk.bf16.mxu1 %vm377_vm5, %v2816_v26  ;;  %1802 = vmatprep.subr.bf16.mxu0 %v2826_v58 }
 0x19c   :  { %1731 = vmatmul.mubr.msk.bf16.gmra.mrb[24].mxu0 %vm377_vm5, %v2817_v39 }
 0x19d   :  { %1734 = vmatprep.mubr.msk.bf16.mxu0 %vm377_vm5, %v311_v0  ;;  %1803 = vmatpush3.bf16.msra.mxu0 %v1909_v24 }
 0x19e   :  { %1804 = vmatprep.subr.bf16.mxu0 %v2826_v58 }
 0x1a1   :  { %1751 = vmatmul.mubr.msk.bf16.gmra.mrb[12].mxu1 %vm377_vm5, %v670_v12  ;;  %1805 = vmatpush3.bf16.msra.mxu0 %v1910_v33 }
 0x1a2   :  { %1754 = vmatprep.mubr.msk.bf16.mxu1 %vm377_vm5, %v2818_v17  ;;  %1806 = vmatprep.subr.bf16.mxu0 %v2826_v58 }
 0x1a4   :  { %1735 = vmatmul.mubr.msk.bf16.gmra.mrb[28].mxu0 %vm377_vm5, %v2819_v51 }
 0x1a5   :  { %1814 = vmatprep.mubr.msk.bf16.mxu0 %vm1941_vm7, %v2826_v58  ;;  %1807 = vmatpush3.bf16.msra.mxu0 %v1911_v63 }
 0x1a6   :  { %1808 = vmatprep.subr.bf16.mxu0 %v2826_v58 }
 0x1a9   :  { %1755 = vmatmul.mubr.msk.bf16.gmra.mrb[16].mxu1 %vm377_vm5, %v2820_v52  ;;  %1809 = vmatpush3.bf16.msra.mxu0 %v1912_v7 }
 0x1aa   :  { %1762 = vmatprep.mubr.msk.bf16.mxu1 %vm377_vm5, %v2821_v23  ;;  %1810 = vmatprep.subr.bf16.mxu0 %v2826_v58 }
 0x1ad   :  { %1811 = vmatpush3.bf16.msra.mxu0 %v1913_v21 }
 0x1ae   :  { %1812 = vmatprep.subr.bf16.mxu0 %v2826_v58 }
 0x1b1   :  { %1763 = vmatmul.mubr.msk.bf16.vlgmr.msra.gmra.mrb[4].mxu1 %vm377_vm5, %v2822_v35 }
 0x1b2   :  { %1779 = vmatpush3.bf16.msra.mxu1 %v1905_v37  ;;  %1766 = vmatprep.mubr.msk.bf16.mxu1 %vm377_vm5, %v2823_v60 }
 0x1b3   :  { %1780 = vmatprep.subr.bf16.mxu1 %v1906_v29 }
 0x1b6   :  { %1781 = vmatpush3.bf16.msra.mxu1 %v1906_v29 }
 0x1b9   :  { %1767 = vmatmul.mubr.msk.bf16.gmra.mrb[8].mxu1 %vm377_vm5, %v2824_v38 }
 0x1ba   :  { %1770 = vmatprep.mubr.msk.bf16.mxu1 %vm377_vm5, %v864_v30  ;;  %v1914_v30 = vld [vmem:[%s2768_s5 + $0x38] sm:$0xff]  }
 0x1bb   :  { %1813 = vmatpush3.bf16.msra.mxu0 %v1914_v30 }
 0x1c1   :  { %1771 = vmatmul.mubr.msk.bf16.gmra.mrb[12].mxu1 %vm377_vm5, %v865_v34 }
 0x1c2   :  { %1774 = vmatprep.mubr.msk.bf16.mxu1 %vm377_vm5, %v866_v15 }
 0x1c9   :  { %1775 = vmatmul.mubr.msk.bf16.gmra.mrb[16].mxu1 %vm377_vm5, %v867_v20 }
 0x1ca   :  { %1782 = vmatprep.mubr.msk.bf16.mxu1 %vm377_vm5, %v1055_v53 }
 0x1d1   :  { %1783 = vmatmul.mubr.msk.bf16.vlgmr.msra.gmra.mrb[4].mxu1 %vm377_vm5, %v2825_v27 }
 0x1d2   :  { %1786 = vmatprep.mubr.msk.bf16.mxu1 %vm377_vm5, %v1057_v57 }
 0x1d9   :  { %1787 = vmatmul.mubr.msk.bf16.gmra.mrb[8].mxu1 %vm377_vm5, %v1058_v3 }
 0x1da   :  { %1790 = vmatprep.mubr.msk.bf16.mxu1 %vm377_vm5, %v1059_v16 }
 0x1e1   :  { %1791 = vmatmul.mubr.msk.bf16.gmra.mrb[12].mxu1 %vm377_vm5, %v1060_v56  ;;  %v2710_v56 = vld [vmem:[%s2767_s4] ss:$0 sm:$0xff] }
 0x1e2   :  { %1794 = vmatprep.mubr.msk.bf16.mxu1 %vm377_vm5, %v1061_v50 }
 0x1e9   :  { %1795 = vmatmul.mubr.msk.bf16.gmra.mrb[16].mxu1 %vm377_vm5, %v1062_v49  ;;  %v2716_v49 = vsel %vm1258_vm8, 0.083333336, %v2826_v58 }
 0x254   :  { %v1716_v31 = vpop.f32.mrb[0].mxu1 }
 0x255   :  { %v484_v10 = vpop.f32.mrb[1].mxu1 }
 0x256   :  { %v1717_v54 = vpop.f32.mrb[2].mxu1 }
 0x257   :  { %v487_v18 = vpop.f32.mrb[3].mxu1 }
 0x25f   :  { %v1724_v19 = vpop.f32.mrb[16].mxu0 }
 0x260   :  { %v569_v55 = vpop.f32.mrb[17].mxu0 }
 0x261   :  { %v1725_v1 = vpop.f32.mrb[18].mxu0 }
 0x262   :  { %v572_v0 = vpop.f32.mrb[19].mxu0 }
 0x267   :  { %v1728_v12 = vpop.f32.mrb[20].mxu0 }
 0x268   :  { %v585_v2 = vpop.f32.mrb[21].mxu0 }
 0x269   :  { %v1729_v53 = vpop.f32.mrb[22].mxu0 }
 0x26a   :  { %v588_v14 = vpop.f32.mrb[23].mxu0 }
 0x26f   :  { %v2686_v62 = vpop.f32.mrb[24].mxu0 }
 0x270   :  { %v2688_v48 = vpop.f32.mrb[25].mxu0 }
 0x271   :  { %v2690_v61 = vpop.f32.mrb[26].mxu0 }
 0x272   :  { %v2695_v4 = vpop.f32.mrb[27].mxu0 }
 0x277   :  { %v1736_v34 = vpop.f32.mrb[28].mxu0 }
 0x278   :  { %v2698_v15 = vadd.f32 %v1736_v34, %v1716_v31  ;;  %v617_v20 = vpop.f32.mrb[29].mxu0 }
 0x279   :  { %v2700_v57 = vadd.f32 %v617_v20, %v484_v10  ;;  %v1737_v3 = vpop.f32.mrb[30].mxu0 }
 0x27a   :  { %v2702_v6 = vadd.f32 %v1737_v3, %v1717_v54  ;;  %v620_v16 = vpop.f32.mrb[31].mxu0 }
 0x27b   :  { %v2704_v42 = vadd.f32 %v620_v16, %v487_v18 }
 0x2a4   :  { %v1784_v46 = vpop.f32.mrb[4].mxu1 }
 0x2a5   :  { %v1822_v8 = vadd.f32 %v1784_v46, %v1724_v19  ;;  %v1138_v45 = vpop.f32.mrb[5].mxu1 }
 0x2a6   :  { %v1823_v32 = vadd.f32 %v1138_v45, %v569_v55  ;;  %v1785_v13 = vpop.f32.mrb[6].mxu1 }
 0x2a7   :  { %v1226_v43 = vadd.f32 %v1822_v8, %v2710_v56  ;;  %v1824_v36 = vadd.f32 %v1785_v13, %v1725_v1  ;;  %v1141_v50 = vpop.f32.mrb[7].mxu1 }
 0x2a8   :  { %v1224_v28 = vadd.f32 %v1823_v32, %v2710_v56  ;;  %v1825_v40 = vadd.f32 %v1141_v50, %v572_v0 }
 0x2a9   :  { %v1242_v47 = vmax.f32 %v1226_v43, 0.0  ;;  %v1227_v5 = vadd.f32 %v1824_v36, %v2710_v56 }
 0x2aa   :  { %v1240_v44 = vmax.f32 %v1224_v28, 0.0  ;;  %v1225_v37 = vadd.f32 %v1825_v40, %v2710_v56 }
 0x2ab   :  { %v1243_v11 = vmax.f32 %v1227_v5, 0.0  ;;  %v1263_v26 = vmul.f32 0.083333336, %v1242_v47 }
 0x2ac   :  { %v1241_v22 = vmax.f32 %v1225_v37, 0.0  ;;  %v1788_v25 = vpop.f32.mrb[8].mxu1  ;;  %v1261_v52 = vmul.f32 0.083333336, %v1240_v44 }
 0x2ad   :  { %v1264_v39 = vmul.f32 %v2716_v49, %v1243_v11  ;;  %v1826_v17 = vadd.f32 %v1788_v25, %v1728_v12  ;;  %v1154_v51 = vpop.f32.mrb[9].mxu1 }
 0x2ae   :  { %v1262_v23 = vmul.f32 %v2716_v49, %v1241_v22  ;;  %v1827_v29 = vadd.f32 %v1154_v51, %v585_v2  ;;  %v1789_v35 = vpop.f32.mrb[10].mxu1 }
 0x2af   :  { %v1284_v60 = vadd.f32 %v1264_v39, %v1263_v26  ;;  %v1230_v38 = vadd.f32 %v1826_v17, %v2710_v56  ;;  %v1828_v27 = vadd.f32 %v1789_v35, %v1729_v53  ;;  %v1157_v41 = vpop.f32.mrb[11].mxu1 }
 0x2b0   :  { %v1277_v31 = vadd.f32 %v1262_v23, %v1261_v52  ;;  %v1228_v58 = vadd.f32 %v1827_v29, %v2710_v56  ;;  %v1829_v59 = vadd.f32 %v1157_v41, %v588_v14 }
 0x2b1   :  { %v1285_v10 = vrot.slane %v1284_v60, 4  ;;  %v1246_v54 = vmax.f32 %v1230_v38, 0.0  ;;  %v1231_v18 = vadd.f32 %v1828_v27, %v2710_v56 }
 0x2b2   :  { %v1278_v24 = vrot.slane %v1277_v31, 4  ;;  %v1244_v19 = vmax.f32 %v1228_v58, 0.0  ;;  %v1229_v55 = vadd.f32 %v1829_v59, %v2710_v56 }
 0x2b3   :  { %v1286_v1 = vadd.f32 %v1285_v10, %v1284_v60  ;;  %v1247_v33 = vmax.f32 %v1231_v18, 0.0  ;;  %v1267_v53 = vmul.f32 0.083333336, %v1246_v54 }
 0x2b4   :  { %v1279_v0 = vadd.f32 %v1278_v24, %v1277_v31  ;;  %v1245_v63 = vmax.f32 %v1229_v55, 0.0  ;;  %v1792_v12 = vpop.f32.mrb[12].mxu1  ;;  %v1265_v34 = vmul.f32 0.083333336, %v1244_v19 }
 0x2b5   :  { %v1287_v2 = vrot.slane %v1286_v1, 2  ;;  %v1268_v7 = vmul.f32 %v2716_v49, %v1247_v33  ;;  %v1830_v21 = vadd.f32 %v1792_v12, %v2686_v62  ;;  %v1170_v14 = vpop.f32.mrb[13].mxu1 }
 0x2b6   :  { %v1280_v30 = vrot.slane %v1279_v0, 2  ;;  %v1266_v20 = vmul.f32 %v2716_v49, %v1245_v63  ;;  %v1831_v3 = vadd.f32 %v1170_v14, %v2688_v48  ;;  %v1793_v16 = vpop.f32.mrb[14].mxu1 }
 0x2b7   :  { %v1288_v9 = vadd.f32 %v1287_v2, %v1286_v1  ;;  %v1298_v46 = vadd.f32 %v1268_v7, %v1267_v53  ;;  %v1234_v8 = vadd.f32 %v1830_v21, %v2710_v56  ;;  %v1832_v45 = vadd.f32 %v1793_v16, %v2690_v61  ;;  %v1173_v32 = vpop.f32.mrb[15].mxu1 }
 0x2b8   :  { %v1281_v13 = vadd.f32 %v1280_v30, %v1279_v0  ;;  %v1291_v43 = vadd.f32 %v1266_v20, %v1265_v34  ;;  %v1232_v62 = vadd.f32 %v1831_v3, %v2710_v56  ;;  %v1833_v36 = vadd.f32 %v1173_v32, %v2695_v4 }
 0x2b9   :  { %v1289_v50 = vrot.slane %v1288_v9, 1  ;;  %v1299_v28 = vrot.slane %v1298_v46, 4  ;;  %v1250_v40 = vmax.f32 %v1234_v8, 0.0  ;;  %v1235_v48 = vadd.f32 %v1832_v45, %v2710_v56 }
 0x2ba   :  { %v1282_v47 = vrot.slane %v1281_v13, 1  ;;  %v1292_v5 = vrot.slane %v1291_v43, 4  ;;  %v1248_v44 = vmax.f32 %v1232_v62, 0.0  ;;  %v1233_v37 = vadd.f32 %v1833_v36, %v2710_v56 }
 0x2bb   :  { %v1290_v11 = vadd.f32 %v1289_v50, %v1288_v9  ;;  %v1300_v22 = vadd.f32 %v1299_v28, %v1298_v46  ;;  %v1271_v61 = vmul.f32 0.083333336, %v1250_v40  ;;  %v1251_v25 = vmax.f32 %v1235_v48, 0.0 }
 0x2bc   :  { %v1283_v26 = vadd.f32 %v1282_v47, %v1281_v13  ;;  %v1293_v39 = vadd.f32 %v1292_v5, %v1291_v43  ;;  %v1269_v17 = vmul.f32 0.083333336, %v1248_v44  ;;  %v1249_v51 = vmax.f32 %v1233_v37, 0.0  ;;  %v1796_v52 = vpop.f32.mrb[16].mxu1 }
 0x2bd   :  { %v1334_v4 = vpack.c.bf16 %v1290_v11, %v1290_v11  ;;  %v1301_v23 = vrot.slane %v1300_v22, 2  ;;  %v1272_v29 = vmul.f32 %v2716_v49, %v1251_v25  ;;  %v1835_v35 = vadd.f32 %v1796_v52, %v2698_v15  ;;  %v1186_v60 = vpop.f32.mrb[17].mxu1 }
 0x2be   :  { %v1333_v38 = vpack.c.bf16 %v1283_v26, %v1283_v26  ;;  %v1294_v27 = vrot.slane %v1293_v39, 2  ;;  %v1270_v41 = vmul.f32 %v2716_v49, %v1249_v51  ;;  %v1837_v31 = vadd.f32 %v1186_v60, %v2700_v57  ;;  %v1797_v58 = vpop.f32.mrb[18].mxu1 }
 0x2bf   :  { %v1373_v59 = vunpack.c.l.b16 %v1334_v4  ;;  %v1302_v10 = vadd.f32 %v1301_v23, %v1300_v22  ;;  %v1312_v54 = vadd.f32 %v1272_v29, %v1271_v61  ;;  %v1238_v18 = vadd.f32 %v1835_v35, %v2710_v56  ;;  %v1189_v24 = vpop.f32.mrb[19].mxu1 }
 0x2c0   :  { %v1372_v19 = vunpack.c.l.b16 %v1333_v38  ;;  %v1295_v55 = vadd.f32 %v1294_v27, %v1293_v39  ;;  %v1305_v1 = vadd.f32 %v1270_v41, %v1269_v17  ;;  %v1839_v15 = vadd.f32 %v1797_v58, %v2702_v6 }
 0x2c1   :  { %v1303_v33 = vrot.slane %v1302_v10, 1  ;;  %v1313_v0 = vrot.slane %v1312_v54, 4  ;;  %v1236_v57 = vadd.f32 %v1837_v31, %v2710_v56  ;;  %v1254_v21 = vmax.f32 %v1238_v18, 0.0 }
 0x2c2   :  { %v1381_v63 = vsel %vm1380_vm9, %v1373_v59, %v1372_v19  ;;  %v1296_v12 = vrot.slane %v1295_v55, 1  ;;  %v1306_v2 = vrot.slane %v1305_v1, 4  ;;  %v1239_v14 = vadd.f32 %v1839_v15, %v2710_v56 }
 0x2c3   :  { %v1304_v53 = vadd.f32 %v1303_v33, %v1302_v10  ;;  %v1314_v7 = vadd.f32 %v1313_v0, %v1312_v54  ;;  %v1841_v20 = vadd.f32 %v1189_v24, %v2704_v42  ;;  %v1252_v8 = vmax.f32 %v1236_v57, 0.0 }
 0x2c4   :  { %v1297_v30 = vadd.f32 %v1296_v12, %v1295_v55  ;;  %v1307_v34 = vadd.f32 %v1306_v2, %v1305_v1  ;;  %v1255_v9 = vmax.f32 %v1239_v14, 0.0  ;;  %v1275_v13 = vmul.f32 0.083333336, %v1254_v21  ;;  %v1594_v1 = vld [vmem:[%s2769_s6] ss:$0 sm:$0xff] }
 0x2c5   :  { %v1336_v3 = vpack.c.bf16 %v1304_v53, %v1304_v53  ;;  %v1315_v16 = vrot.slane %v1314_v7, 2  ;;  %v1237_v45 = vadd.f32 %v1841_v20, %v2710_v56  ;;  %v1273_v5 = vmul.f32 0.083333336, %v1252_v8 }
 0x2c6   :  { %v1335_v46 = vpack.c.bf16 %v1297_v30, %v1297_v30  ;;  %v1308_v6 = vrot.slane %v1307_v34, 2  ;;  %v1276_v43 = vmul.f32 %v2716_v49, %v1255_v9 }
 0x2c7   :  { %v1316_v32 = vadd.f32 %v1315_v16, %v1314_v7  ;;  %v1253_v50 = vmax.f32 %v1237_v45, 0.0  ;;  %v1375_v28 = vunpack.c.l.b16 %v1336_v3 }
 0x2c8   :  { %v1374_v62 = vunpack.c.l.b16 %v1335_v46  ;;  %v1309_v36 = vadd.f32 %v1308_v6, %v1307_v34  ;;  %v1326_v42 = vadd.f32 %v1276_v43, %v1275_v13 }
 0x2c9   :  { %v1317_v40 = vrot.slane %v1316_v32, 1  ;;  %v1274_v44 = vmul.f32 %v2716_v49, %v1253_v50 }
 0x2ca   :  { %v1383_v48 = vsel %vm1382_vm10, %v1374_v62, %v1381_v63  ;;  %v1310_v47 = vrot.slane %v1309_v36, 1  ;;  %v1327_v56 = vrot.slane %v1326_v42, 4 }
 0x2cb   :  { %v1318_v37 = vadd.f32 %v1317_v40, %v1316_v32  ;;  %v1385_v11 = vsel %vm1384_vm11, %v1375_v28, %v1383_v48  ;;  %v1319_v61 = vadd.f32 %v1274_v44, %v1273_v5 }
 0x2cc   :  { %v1311_v22 = vadd.f32 %v1310_v47, %v1309_v36  ;;  %v1328_v26 = vadd.f32 %v1327_v56, %v1326_v42 }
 0x2cd   :  { %v1338_v25 = vpack.c.bf16 %v1318_v37, %v1318_v37  ;;  %v1320_v17 = vrot.slane %v1319_v61, 4 }
 0x2ce   :  { %v1337_v39 = vpack.c.bf16 %v1311_v22, %v1311_v22  ;;  %v1329_v51 = vrot.slane %v1328_v26, 2 }
 0x2cf   :  { %v1321_v4 = vadd.f32 %v1320_v17, %v1319_v61  ;;  %v1377_v23 = vunpack.c.l.b16 %v1338_v25 }
 0x2d0   :  { %v1376_v52 = vunpack.c.l.b16 %v1337_v39  ;;  %v1330_v29 = vadd.f32 %v1329_v51, %v1328_v26 }
 0x2d1   :  { %v1322_v60 = vrot.slane %v1321_v4, 2 }
 0x2d2   :  { %v1387_v35 = vsel %vm1386_vm12, %v1376_v52, %v1385_v11  ;;  %v1331_v38 = vrot.slane %v1330_v29, 1 }
 0x2d3   :  { %v1389_v49 = vsel %vm1388_vm13, %v1377_v23, %v1387_v35  ;;  %v1323_v27 = vadd.f32 %v1322_v60, %v1321_v4 }
 0x2d4   :  { %v1332_v41 = vadd.f32 %v1331_v38, %v1330_v29 }
 0x2d5   :  { %v1324_v31 = vrot.slane %v1323_v27, 1 }
 0x2d6   :  { %v1340_v59 = vpack.c.bf16 %v1332_v41, %v1332_v41 }
 0x2d7   :  { %v1325_v58 = vadd.f32 %v1324_v31, %v1323_v27 }
 0x2d8   :  { %v1379_v18 = vunpack.c.l.b16 %v1340_v59 }
 0x2d9   :  { %v1339_v10 = vpack.c.bf16 %v1325_v58, %v1325_v58 }
 0x2db   :  { %v1378_v54 = vunpack.c.l.b16 %v1339_v10 }
 0x2dd   :  { %v1391_v24 = vsel %vm1390_vm14, %v1378_v54, %v1389_v49 }
 0x2de   :  { %v1393_v19 = vsel %vm1392_vm15, %v1379_v18, %v1391_v24 }
 0x2df   :  { %v1394_v55 = vpack.c.b16 %v1393_v19, %v1393_v19 }
 0x2e1   :  { %1815 = vmatmul.mubr.bf16.vlgmr.msra.gmra.mrb[32].mxu0 %v1394_v55 }
 0x3b4   :  { %v1478_v33 = vpop.f32.mrb[32].mxu0 }
 0x3b5   :  { %v1479_v0 = vadd.f32 %v1594_v1, %v1478_v33  ;;  %v1816_v15 = vpop.f32.mrb[33].mxu0 }
 0x3b6   :  { %v1481_v63 = vpop.f32.mrb[34].mxu0 }
 0x3b7   :  { %1484 = vst [vmem:[#allocation3] sm:$0xff] %v1479_v0  ;;  %v1817_v12 = vpop.f32.mrb[35].mxu0 }
 0x3b8   :  { %1926 = shalt.err (!%p1923_p4)
}
 0x3b9   :  { %s1927_s6 = scalar_lea.hbm %s2770_s7, 128 }
 0x3ba   :  { %p1928_p5 = scmp.ne.s32.totalorder %s2770_s7, %s1927_s6  ;;  %p1931_p6 = scmp.lt.u32.totalorder %s1927_s6, %s2770_s7 }
 0x3bc   :  { %p1933_p7 = pnand %p1931_p6, %p1928_p5 }
 0x3be   :  { %1936 = shalt.err (!%p1933_p7)
}
 0x3bf   :  { %1494 = dma.vmem_to_hbm [thread:$0]  %s1492_s25, 128, %s2770_s7, [#allocation4]  }
 0x3c0   :  { %1937 = dma.done.wait [#allocation4], 128  }
 0x3c1   :  { %1938 = vsyncadd [#allocation4], 4294967168 }
 0x3c2   :  { %1498 = vsyncpa [#allocation4], 1 }

</bundles_post_ra>
